<compile_context>
chip_gen: v7x
topology: tpu7x:2x2x1
jax: 0.10.0
libtpu: 0.0.40
codegen_flags: <defaults>
</compile_context>

<pallas_src>
import jax
import jax.numpy as jnp
from jax.experimental import pallas as pl
from jax.experimental.pallas import tpu as pltpu

_LANE = 128      # vreg lane width (last dim)
_SUBLANE = 8     # vreg sublane width (second-to-last dim)


def _round_up(x, m):
    return (x + m - 1) // m * m


def _actor_kernel(act_limit_ref, x_ref, w1_ref, b1_ref, w2_ref, b2_ref,
                  w3_ref, b3_ref, o_ref):
    """Fused MLP actor: (Linear->ReLU) x2 -> Linear -> Tanh -> scale."""
    x = x_ref[...]

    h = jnp.dot(x, w1_ref[...], preferred_element_type=jnp.float32) + b1_ref[...]
    h = jnp.maximum(h, 0.0)  # ReLU (VPU)

    h = jnp.dot(h, w2_ref[...], preferred_element_type=jnp.float32) + b2_ref[...]
    h = jnp.maximum(h, 0.0)  # ReLU (VPU)

    h = jnp.dot(h, w3_ref[...], preferred_element_type=jnp.float32) + b3_ref[...]
    # tanh goes to the EUP slot, the scale to the VPU slot -- free under the
    # MXU/DMA slack.  act_limit comes from SMEM (traced scalar).
    o_ref[...] = act_limit_ref[0, 0] * jnp.tanh(h)


def prepare_actor_params(params):
    """One-time parameter layout prep (call once at init, reuse every step).

    Only the hidden dims are zero-padded (to the 128-lane width) so weights
    and intermediate activations are lane-dense; obs_dim (K of the first
    matmul) and act_dim (output width) keep their native sizes so per-call
    HBM streams stay small.  Zero padding is exact: padded hidden cols get
    zero weight cols + zero bias (ReLU(0)=0) and hit zero weight rows in the
    next layer.
    """
    obs_dim, h1 = params["w1"].shape
    h2 = params["w2"].shape[1]
    act_dim = params["w3"].shape[1]
    h1_p = _round_up(h1, _LANE)
    h2_p = _round_up(h2, _LANE)

    def pad2(a, rows, cols):
        a = a.astype(jnp.float32)
        return jnp.pad(a, ((0, rows - a.shape[0]), (0, cols - a.shape[1])))

    return {
        "w1": pad2(params["w1"], obs_dim, h1_p),   # (obs_dim, h1_p)
        "b1": pad2(params["b1"], 1, h1_p),
        "w2": pad2(params["w2"], h1_p, h2_p),
        "b2": pad2(params["b2"], 1, h2_p),
        "w3": pad2(params["w3"], h2_p, act_dim),   # output width stays native
        "b3": params["b3"].astype(jnp.float32),
    }


def mlp_actor_forward(obs, padded_params, act_limit, *, batch_tile=None):
    """Runs the fused actor MLP.

    obs:           (B, obs_dim) float32
    padded_params: output of prepare_actor_params() (cached, reused)
    act_limit:     scalar (passed as traced SMEM input; no recompile per value)
    """
    if obs.dtype != jnp.float32:
        obs = obs.astype(jnp.float32)
    B, obs_dim = obs.shape
    w1, b1 = padded_params["w1"], padded_params["b1"]
    w2, b2 = padded_params["w2"], padded_params["b2"]
    w3, b3 = padded_params["w3"], padded_params["b3"]
    assert w1.shape[0] == obs_dim, "obs_dim mismatch with prepared params"
    h1_p = w1.shape[1]
    h2_p = w2.shape[1]
    act_dim = w3.shape[1]

    # ---- Batch tiling: one block for small B (per-step overhead >> compute);
    # otherwise >= 2 "parallel" steps (both v7x TensorCores get work) with
    # tiles of up to 1024 rows (per-step DMA >> ~0.35us grid-step overhead,
    # still only ~a few 10s of KiB per double-buffered tile at these widths).
    if batch_tile is None:
        if B <= 256:
            batch_tile = _round_up(B, _SUBLANE)
        else:
            batch_tile = min(1024, _round_up(pl.cdiv(B, 2), _SUBLANE))
    B_pad = _round_up(B, batch_tile)
    grid = (B_pad // batch_tile,)

    # Only the batch axis may need padding; skip the copy entirely if aligned.
    obs_pd = obs if B_pad == B else jnp.pad(obs, ((0, B_pad - B), (0, 0)))

    act_limit_arr = jnp.asarray(act_limit, jnp.float32).reshape(1, 1)

    # Weights/biases are small and fully VMEM-resident (constant index_map).
    # TODO(synk): for multi-MiB hiddens on v7x (64 MiB VMEM) single-buffer the
    # resident weights (pipeline_mode=pl.Buffered(1)), size vmem_limit_bytes
    # against the 32 MiB scoped default, and consider bf16 obs/weights with
    # f32 MXU accumulation to halve the HBM streams.
    full = lambda shape: pl.BlockSpec(shape, lambda i: (0, 0))

    out = pl.pallas_call(
        _actor_kernel,
        out_shape=jax.ShapeDtypeStruct((B_pad, act_dim), jnp.float32),
        grid=grid,
        in_specs=[
            pl.BlockSpec(memory_space=pltpu.MemorySpace.SMEM),      # act_limit
            pl.BlockSpec((batch_tile, obs_dim), lambda i: (i, 0)),  # obs tile
            full((obs_dim, h1_p)), full((1, h1_p)),
            full((h1_p, h2_p)), full((1, h2_p)),
            full((h2_p, act_dim)), full((1, act_dim)),
        ],
        out_specs=pl.BlockSpec((batch_tile, act_dim), lambda i: (i, 0)),
        compiler_params=pltpu.CompilerParams(
            dimension_semantics=("parallel",)),
    )(act_limit_arr, obs_pd, w1, b1, w2, b2, w3, b3)

    # Strip only the batch padding (output stays at native act_dim width).
    return out if B_pad == B else out[:B]


def init_params(key, obs_dim, hidden_sizes, act_dim):
    """Deterministic synthetic init (shapes match nn.Linear layers)."""
    sizes = [obs_dim] + list(hidden_sizes) + [act_dim]
    params = {}
    for idx, (fan_in, fan_out) in enumerate(zip(sizes[:-1], sizes[1:]), start=1):
        key, kw, kb = jax.random.split(key, 3)
        bound = 1.0 / jnp.sqrt(fan_in)  # matches PyTorch Linear default scale
        params[f"w{idx}"] = jax.random.uniform(
            kw, (fan_in, fan_out), jnp.float32, -bound, bound)
        params[f"b{idx}"] = jax.random.uniform(
            kb, (1, fan_out), jnp.float32, -bound, bound)
    return params


def reference_forward(obs, params, act_limit):
    h = jnp.maximum(obs @ params["w1"] + params["b1"], 0.0)
    h = jnp.maximum(h @ params["w2"] + params["b2"], 0.0)
    h = h @ params["w3"] + params["b3"]
    return act_limit * jnp.tanh(h)


if __name__ == "__main__":
    key = jax.random.PRNGKey(0)

    batch = 16
    obs_dim = 8
    hidden_sizes = (32, 32)
    act_dim = 4
    act_limit = 2.0

    key, k_obs = jax.random.split(key)
    obs = jax.random.normal(k_obs, (batch, obs_dim), jnp.float32)
    params = init_params(key, obs_dim, hidden_sizes, act_dim)
    padded = prepare_actor_params(params)   # one-time padding, cached

    out = jax.block_until_ready(mlp_actor_forward(obs, padded, act_limit))
    ref = reference_forward(obs, params, act_limit)
    assert out.shape == (batch, act_dim)
    assert jnp.allclose(out, ref, atol=1e-5, rtol=1e-5)

    # Ragged batch (not a multiple of the sublane tile): exercised via padding.
    obs_small = obs[:5]
    out_small = jax.block_until_ready(
        mlp_actor_forward(obs_small, padded, act_limit))
    ref_small = reference_forward(obs_small, params, act_limit)
    assert out_small.shape == (5, act_dim)
    assert jnp.allclose(out_small, ref_small, atol=1e-5, rtol=1e-5)

    # Larger batch: exercises the multi-step "parallel" grid (>= 2 tiles).
    key, k_big = jax.random.split(key)
    obs_big = jax.random.normal(k_big, (600, obs_dim), jnp.float32)
    out_big = jax.block_until_ready(
        mlp_actor_forward(obs_big, padded, act_limit))
    ref_big = reference_forward(obs_big, params, act_limit)
    assert out_big.shape == (600, act_dim)
    assert jnp.allclose(out_big, ref_big, atol=1e-5, rtol=1e-5)

    print("KERNEL_OK")
</pallas_src>

<mosaic_0001>
module attributes {stable_mosaic.version = 11 : i64} {
  func.func @_actor_kernel(%arg0: i32, %arg1: memref<1x1xf32, #tpu.memory_space<smem>>, %arg2: memref<16x8xf32, #tpu.memory_space<vmem>>, %arg3: memref<8x128xf32, #tpu.memory_space<vmem>>, %arg4: memref<1x128xf32, #tpu.memory_space<vmem>>, %arg5: memref<128x128xf32, #tpu.memory_space<vmem>>, %arg6: memref<1x128xf32, #tpu.memory_space<vmem>>, %arg7: memref<128x4xf32, #tpu.memory_space<vmem>>, %arg8: memref<1x4xf32, #tpu.memory_space<vmem>>, %arg9: memref<16x4xf32, #tpu.memory_space<vmem>>) attributes {dimension_semantics = [#tpu.dimension_semantics<parallel>], iteration_bounds = array<i64: 1>, scalar_prefetch = 0 : i64, scratch_operands = 0 : i64, tpu.core_type = #tpu.core_type<tc>, window_params = [{transform_indices = @transform_0, window_bounds = array<i64: 1, 1>}, {transform_indices = @transform_1, window_bounds = array<i64: 16, 8>}, {pipeline_mode = #tpu.pipeline_mode<synchronous>, transform_indices = @transform_2, window_bounds = array<i64: 8, 128>}, {pipeline_mode = #tpu.pipeline_mode<synchronous>, transform_indices = @transform_3, window_bounds = array<i64: 1, 128>}, {pipeline_mode = #tpu.pipeline_mode<synchronous>, transform_indices = @transform_4, window_bounds = array<i64: 128, 128>}, {pipeline_mode = #tpu.pipeline_mode<synchronous>, transform_indices = @transform_5, window_bounds = array<i64: 1, 128>}, {pipeline_mode = #tpu.pipeline_mode<synchronous>, transform_indices = @transform_6, window_bounds = array<i64: 128, 4>}, {pipeline_mode = #tpu.pipeline_mode<synchronous>, transform_indices = @transform_7, window_bounds = array<i64: 1, 4>}, {transform_indices = @transform_8, window_bounds = array<i64: 16, 4>}]} {
    %c0 = arith.constant 0 : index
    %c0_0 = arith.constant 0 : index
    %0 = vector.load %arg2[%c0, %c0_0] : memref<16x8xf32, #tpu.memory_space<vmem>>, vector<16x8xf32>
    %c0_1 = arith.constant 0 : index
    %c0_2 = arith.constant 0 : index
    %1 = vector.load %arg3[%c0_1, %c0_2] : memref<8x128xf32, #tpu.memory_space<vmem>>, vector<8x128xf32>
    %cst = arith.constant dense<0.000000e+00> : vector<16x128xf32>
    %2 = tpu.matmul %0, %1, %cst {dimension_numbers = #tpu.dot_dimension_numbers<[1], [0], [0], [1], [0, 0, 1, 1], [], []>} : vector<16x8xf32>, vector<8x128xf32>, vector<16x128xf32> -> vector<16x128xf32>
    %c0_3 = arith.constant 0 : index
    %c0_4 = arith.constant 0 : index
    %3 = vector.load %arg4[%c0_3, %c0_4] : memref<1x128xf32, #tpu.memory_space<vmem>>, vector<1x128xf32>
    %4 = vector.broadcast %3 : vector<1x128xf32> to vector<16x128xf32>
    %5 = arith.addf %2, %4 : vector<16x128xf32>
    %cst_5 = arith.constant 0.000000e+00 : f32
    %6 = vector.broadcast %cst_5 : f32 to vector<16x128xf32>
    %7 = arith.maximumf %5, %6 : vector<16x128xf32>
    %c0_6 = arith.constant 0 : index
    %c0_7 = arith.constant 0 : index
    %8 = vector.load %arg5[%c0_6, %c0_7] : memref<128x128xf32, #tpu.memory_space<vmem>>, vector<128x128xf32>
    %cst_8 = arith.constant dense<0.000000e+00> : vector<16x128xf32>
    %9 = tpu.matmul %7, %8, %cst_8 {dimension_numbers = #tpu.dot_dimension_numbers<[1], [0], [0], [1], [0, 0, 1, 1], [], []>} : vector<16x128xf32>, vector<128x128xf32>, vector<16x128xf32> -> vector<16x128xf32>
    %c0_9 = arith.constant 0 : index
    %c0_10 = arith.constant 0 : index
    %10 = vector.load %arg6[%c0_9, %c0_10] : memref<1x128xf32, #tpu.memory_space<vmem>>, vector<1x128xf32>
    %11 = vector.broadcast %10 : vector<1x128xf32> to vector<16x128xf32>
    %12 = arith.addf %9, %11 : vector<16x128xf32>
    %cst_11 = arith.constant 0.000000e+00 : f32
    %13 = vector.broadcast %cst_11 : f32 to vector<16x128xf32>
    %14 = arith.maximumf %12, %13 : vector<16x128xf32>
    %c0_12 = arith.constant 0 : index
    %c0_13 = arith.constant 0 : index
    %15 = vector.load %arg7[%c0_12, %c0_13] : memref<128x4xf32, #tpu.memory_space<vmem>>, vector<128x4xf32>
    %cst_14 = arith.constant dense<0.000000e+00> : vector<16x4xf32>
    %16 = tpu.matmul %14, %15, %cst_14 {dimension_numbers = #tpu.dot_dimension_numbers<[1], [0], [0], [1], [0, 0, 1, 1], [], []>} : vector<16x128xf32>, vector<128x4xf32>, vector<16x4xf32> -> vector<16x4xf32>
    %c0_15 = arith.constant 0 : index
    %c0_16 = arith.constant 0 : index
    %17 = vector.load %arg8[%c0_15, %c0_16] : memref<1x4xf32, #tpu.memory_space<vmem>>, vector<1x4xf32>
    %18 = vector.broadcast %17 : vector<1x4xf32> to vector<16x4xf32>
    %19 = arith.addf %16, %18 : vector<16x4xf32>
    %c0_17 = arith.constant 0 : index
    %c0_18 = arith.constant 0 : index
    %20 = memref.load %arg1[%c0_17, %c0_18] : memref<1x1xf32, #tpu.memory_space<smem>>
    %21 = math.tanh %19 : vector<16x4xf32>
    %22 = vector.broadcast %20 : f32 to vector<16x4xf32>
    %23 = arith.mulf %22, %21 : vector<16x4xf32>
    %c0_19 = arith.constant 0 : index
    %c0_20 = arith.constant 0 : index
    %24 = vector.load %arg9[%c0_19, %c0_20] : memref<16x4xf32, #tpu.memory_space<vmem>>, vector<16x4xf32>
    tpu.vector_store %arg9[%c0_19, %c0_20], %23 {strides = array<i32>} : memref<16x4xf32, #tpu.memory_space<vmem>>, vector<16x4xf32>,
    return
  }
  func.func @transform_0(%arg0: i32) -> (i32, i32) {
    %c0_i32 = arith.constant 0 : i32
    %c0_i32_0 = arith.constant 0 : i32
    %c0_i32_1 = arith.constant 0 : i32
    return %c0_i32, %c0_i32_0 : i32, i32
  }
  func.func @transform_1(%arg0: i32) -> (i32, i32) {
    %c0_i32 = arith.constant 0 : i32
    %c0_i32_0 = arith.constant 0 : i32
    return %arg0, %c0_i32 : i32, i32
  }
  func.func @transform_2(%arg0: i32) -> (i32, i32) {
    %c0_i32 = arith.constant 0 : i32
    %c0_i32_0 = arith.constant 0 : i32
    %c0_i32_1 = arith.constant 0 : i32
    return %c0_i32, %c0_i32_0 : i32, i32
  }
  func.func @transform_3(%arg0: i32) -> (i32, i32) {
    %c0_i32 = arith.constant 0 : i32
    %c0_i32_0 = arith.constant 0 : i32
    %c0_i32_1 = arith.constant 0 : i32
    return %c0_i32, %c0_i32_0 : i32, i32
  }
  func.func @transform_4(%arg0: i32) -> (i32, i32) {
    %c0_i32 = arith.constant 0 : i32
    %c0_i32_0 = arith.constant 0 : i32
    %c0_i32_1 = arith.constant 0 : i32
    return %c0_i32, %c0_i32_0 : i32, i32
  }
  func.func @transform_5(%arg0: i32) -> (i32, i32) {
    %c0_i32 = arith.constant 0 : i32
    %c0_i32_0 = arith.constant 0 : i32
    %c0_i32_1 = arith.constant 0 : i32
    return %c0_i32, %c0_i32_0 : i32, i32
  }
  func.func @transform_6(%arg0: i32) -> (i32, i32) {
    %c0_i32 = arith.constant 0 : i32
    %c0_i32_0 = arith.constant 0 : i32
    %c0_i32_1 = arith.constant 0 : i32
    return %c0_i32, %c0_i32_0 : i32, i32
  }
  func.func @transform_7(%arg0: i32) -> (i32, i32) {
    %c0_i32 = arith.constant 0 : i32
    %c0_i32_0 = arith.constant 0 : i32
    %c0_i32_1 = arith.constant 0 : i32
    return %c0_i32, %c0_i32_0 : i32, i32
  }
  func.func @transform_8(%arg0: i32) -> (i32, i32) {
    %c0_i32 = arith.constant 0 : i32
    %c0_i32_0 = arith.constant 0 : i32
    return %arg0, %c0_i32 : i32, i32
  }
}

</mosaic_0001>

<bundles_post_ra>
// kernel: tpu_custom_call.1
= control target key start
LH: loop header
LB: loop body
LE: loop exit
PB: predicated region body
PF: predicated region fallthrough
CT: control target
= control target key end

     0   :  { %vm40_vm0 = vcmask 64512   ;;  %vm328_vm1 = vcmask 31744   ;;  %s690_s2 = inlined_call_operand.vmem [shape: f32[8,128], index: 2, kind: input, shape index: {}]   ;;  %s691_s1 = inlined_call_operand.vmem [shape: f32[16,8], index: 1, kind: input, shape index: {}]   ;;  %s692_s4 = inlined_call_operand.vmem [shape: f32[128,128], index: 4, kind: input, shape index: {}]   ;;  %s693_s6 = inlined_call_operand.vmem [shape: f32[128,4], index: 6, kind: input, shape index: {}]   ;;  %s694_s3 = inlined_call_operand.vmem [shape: f32[1,128], index: 3, kind: input, shape index: {}]   ;;  %s695_s5 = inlined_call_operand.vmem [shape: f32[1,128], index: 5, kind: input, shape index: {}]   ;;  %s696_s7 = inlined_call_operand.vmem [shape: f32[1,4], index: 7, kind: input, shape index: {}]   ;;  %s697_s0 = inlined_call_operand.<no memory space> [shape: f32[1,1], index: 0, kind: input, shape index: {}]   ;;  %s698_s8 = inlined_call_operand.vmem [shape: f32[16,4], index: 8, kind: output, shape index: {}]  }
   0x1   :  { %v32_v0 = vld [vmem:[%s690_s2] sm:$0xff]  ;;  %v31_v2 = vld [vmem:[%s691_s1 + $0x8] sm:$0xff]  ;;  %v126_v5 = vld [vmem:[%s692_s4 + $0x10] sm:$0xff] }
   0x2   :  { %v30_v1 = vld [vmem:[%s691_s1] sm:$0xff]  ;;  %379 = vmatprep.subr.mxu0 %v32_v0  ;;  %v125_v4 = vld [vmem:[%s692_s4 + $0x8] sm:$0xff]  ;;  %v127_v7 = vld [vmem:[%s692_s4 + $0x18] sm:$0xff] }
   0x3   :  { %381 = vmatprep.mubr.msk.f32.mxu0 %vm40_vm0, %v30_v1  ;;  %v124_v3 = vld [vmem:[%s692_s4] sm:$0xff]  ;;  %380 = vmatpush3.msra.mxu0 %v32_v0  ;;  %v458_v8 = vpack.c.bf16 %v127_v7, %v126_v5  ;;  %v129_v10 = vld [vmem:[%s692_s4 + $0x28] sm:$0xff]  ;;  %v130_v12 = vld [vmem:[%s692_s4 + $0x30] sm:$0xff] }
   0x4   :  { %v454_v6 = vpack.c.bf16 %v125_v4, %v124_v3  ;;  %382 = vmatmul.mubr.msk.f32.vlgmr.msra.gmra.mrb[0].mxu0 %vm40_vm0, %v31_v2  ;;  %v128_v9 = vld [vmem:[%s692_s4 + $0x20] sm:$0xff]  ;;  %v131_v13 = vld [vmem:[%s692_s4 + $0x38] sm:$0xff]  ;;  %v133_v16 = vld [vmem:[%s692_s4 + $0x48] sm:$0xff] }
   0x5   :  { %v462_v11 = vpack.c.bf16 %v129_v10, %v128_v9  ;;  %v466_v14 = vpack.c.bf16 %v131_v13, %v130_v12  ;;  %v132_v15 = vld [vmem:[%s692_s4 + $0x40] sm:$0xff]  ;;  %v134_v18 = vld [vmem:[%s692_s4 + $0x50] sm:$0xff]  ;;  %v135_v19 = vld [vmem:[%s692_s4 + $0x58] sm:$0xff] }
   0x6   :  { %455 = vmatprep.subr.bf16.mxu1 %v454_v6  ;;  %v470_v17 = vpack.c.bf16 %v133_v16, %v132_v15  ;;  %v474_v20 = vpack.c.bf16 %v135_v19, %v134_v18  ;;  %v136_v21 = vld [vmem:[%s692_s4 + $0x60] sm:$0xff]  ;;  %v137_v22 = vld [vmem:[%s692_s4 + $0x68] sm:$0xff]  ;;  %v138_v24 = vld [vmem:[%s692_s4 + $0x70] sm:$0xff] }
   0x7   :  { %457 = vmatpush3.bf16.msra.mxu1 %v454_v6  ;;  %v478_v23 = vpack.c.bf16 %v137_v22, %v136_v21  ;;  %v139_v25 = vld [vmem:[%s692_s4 + $0x78] sm:$0xff]  ;;  %v224_v27 = vld [vmem:[%s693_s6] sm:$0xff]  ;;  %v225_v28 = vld [vmem:[%s693_s6 + $0x8] sm:$0xff]  ;;  %v325_v6 = vstv %s697_s0 }
   0x8   :  { %459 = vmatprep.subr.bf16.mxu1 %v458_v8  ;;  %v482_v26 = vpack.c.bf16 %v139_v25, %v138_v24  ;;  %v226_v29 = vld [vmem:[%s693_s6 + $0x10] sm:$0xff]  ;;  %v486_v30 = vpack.c.bf16 %v225_v28, %v224_v27  ;;  %v227_v31 = vld [vmem:[%s693_s6 + $0x18] sm:$0xff]  ;;  %v228_v33 = vld [vmem:[%s693_s6 + $0x20] sm:$0xff] }
   0x9   :  { %v490_v32 = vpack.c.bf16 %v227_v31, %v226_v29  ;;  %v229_v34 = vld [vmem:[%s693_s6 + $0x28] sm:$0xff]  ;;  %v230_v36 = vld [vmem:[%s693_s6 + $0x30] sm:$0xff]  ;;  %v231_v37 = vld [vmem:[%s693_s6 + $0x38] sm:$0xff] }
   0xa   :  { %487 = vmatprep.subr.bf16.mxu0 %v486_v30  ;;  %v494_v35 = vpack.c.bf16 %v229_v34, %v228_v33  ;;  %v498_v38 = vpack.c.bf16 %v231_v37, %v230_v36  ;;  %v232_v39 = vld [vmem:[%s693_s6 + $0x40] sm:$0xff]  ;;  %v233_v40 = vld [vmem:[%s693_s6 + $0x48] sm:$0xff]  ;;  %v234_v42 = vld [vmem:[%s693_s6 + $0x50] sm:$0xff] }
   0xb   :  { %461 = vmatpush3.bf16.msra.mxu1 %v458_v8  ;;  %489 = vmatpush3.bf16.msra.mxu0 %v486_v30  ;;  %v502_v41 = vpack.c.bf16 %v233_v40, %v232_v39  ;;  %v235_v43 = vld [vmem:[%s693_s6 + $0x58] sm:$0xff]  ;;  %v236_v45 = vld [vmem:[%s693_s6 + $0x60] sm:$0xff]  ;;  %v237_v46 = vld [vmem:[%s693_s6 + $0x68] sm:$0xff] }
   0xc   :  { %463 = vmatprep.subr.bf16.mxu1 %v462_v11  ;;  %491 = vmatprep.subr.bf16.mxu0 %v490_v32  ;;  %v506_v44 = vpack.c.bf16 %v235_v43, %v234_v42  ;;  %v510_v47 = vpack.c.bf16 %v237_v46, %v236_v45  ;;  %v335_v48 = vld [vmem:[%s694_s3] ss:$0 sm:$0xff]  ;;  %v238_v55 = vld [vmem:[%s693_s6 + $0x70] sm:$0xff]  ;;  %v239_v56 = vld [vmem:[%s693_s6 + $0x78] sm:$0xff] }
   0xd   :  { %v514_v57 = vpack.c.bf16 %v239_v56, %v238_v55  ;;  %v338_v58 = vld [vmem:[%s695_s5] ss:$0 sm:$0xff] }
   0xe   :  { %v339_v1 = vld [vmem:[%s696_s7] ss:$0 sm:$0xff] }
   0xf   :  { %465 = vmatpush3.bf16.msra.mxu1 %v462_v11  ;;  %493 = vmatpush3.bf16.msra.mxu0 %v490_v32 }
  0x10   :  { %467 = vmatprep.subr.bf16.mxu1 %v466_v14  ;;  %495 = vmatprep.subr.bf16.mxu0 %v494_v35 }
  0x13   :  { %469 = vmatpush3.bf16.msra.mxu1 %v466_v14  ;;  %497 = vmatpush3.bf16.msra.mxu0 %v494_v35 }
  0x14   :  { %471 = vmatprep.subr.bf16.mxu1 %v470_v17  ;;  %499 = vmatprep.subr.bf16.mxu0 %v498_v38 }
  0x17   :  { %473 = vmatpush3.bf16.msra.mxu1 %v470_v17  ;;  %501 = vmatpush3.bf16.msra.mxu0 %v498_v38 }
  0x18   :  { %475 = vmatprep.subr.bf16.mxu1 %v474_v20  ;;  %503 = vmatprep.subr.bf16.mxu0 %v502_v41 }
  0x1b   :  { %477 = vmatpush3.bf16.msra.mxu1 %v474_v20  ;;  %505 = vmatpush3.bf16.msra.mxu0 %v502_v41 }
  0x1c   :  { %479 = vmatprep.subr.bf16.mxu1 %v478_v23  ;;  %507 = vmatprep.subr.bf16.mxu0 %v506_v44 }
  0x1f   :  { %481 = vmatpush3.bf16.msra.mxu1 %v478_v23  ;;  %509 = vmatpush3.bf16.msra.mxu0 %v506_v44 }
  0x20   :  { %483 = vmatprep.subr.bf16.mxu1 %v482_v26  ;;  %511 = vmatprep.subr.bf16.mxu0 %v510_v47 }
  0x23   :  { %485 = vmatpush3.bf16.msra.mxu1 %v482_v26  ;;  %513 = vmatpush3.bf16.msra.mxu0 %v510_v47 }
  0x24   :  { %515 = vmatprep.subr.bf16.mxu0 %v514_v57 }
  0x27   :  { %517 = vmatpush3.bf16.msra.mxu0 %v514_v57 }
  0xd7   :  { %v383_v49 = vpop.f32.mrb[0].mxu0 }
  0xd8   :  { %v119_v50 = vadd.f32 %v383_v49, %v335_v48  ;;  %v113_v51 = vpop.f32.mrb[1].mxu0 }
  0xd9   :  { %v114_v52 = vadd.f32 %v335_v48, %v113_v51 }
  0xda   :  { %v123_v54 = vmax.f32 %v119_v50, 0.0 }
  0xdb   :  { %v122_v53 = vmax.f32 %v114_v52, 0.0 }
  0xdd   :  { %416 = vmatprep.mubr.f32.mxu1 %v122_v53 }
  0xde   :  { %417 = vmatmul.mubr.f32.vlgmr.msra.gmra.mrb[0].mxu1 %v123_v54 }
 0x1b1   :  { %v418_v59 = vpop.f32.mrb[0].mxu1 }
 0x1b2   :  { %v219_v60 = vadd.f32 %v418_v59, %v338_v58  ;;  %v213_v61 = vpop.f32.mrb[1].mxu1 }
 0x1b3   :  { %v214_v62 = vadd.f32 %v338_v58, %v213_v61 }
 0x1b4   :  { %v223_v0 = vmax.f32 %v219_v60, 0.0 }
 0x1b5   :  { %v222_v63 = vmax.f32 %v214_v62, 0.0 }
 0x1b7   :  { %451 = vmatprep.mubr.f32.mxu0 %v222_v63 }
 0x1b8   :  { %452 = vmatmul.mubr.f32.vlgmr.msra.gmra.mrb[2].mxu0 %v223_v0 }
 0x28b   :  { %v453_v2 = vpop.f32.mrb[2].mxu0 }
 0x28c   :  { %v319_v3 = vadd.f32 %v453_v2, %v339_v1  ;;  %v313_v4 = vpop.f32.mrb[3].mxu0 }
 0x28d   :  { %v314_v5 = vadd.f32 %v339_v1, %v313_v4 }
 0x28e   :  { %518 = vtanh.f32 %v319_v3 }
 0x28f   :  { %520 = vtanh.f32 %v314_v5 }
 0x298   :  { %v519_v7 = vpop.eup %518 }
 0x299   :  { %v521_v8 = vpop.eup %520  ;;  %v327_v9 = vmul.f32 %v519_v7, %v325_v6 }
 0x29a   :  { %v326_v10 = vmul.f32 %v521_v8, %v325_v6 }
 0x29b   :  { %330 = vst.msk [vmem:[%s698_s8 + $0x8] sm:$0xff] %vm328_vm1, %v327_v9 }
 0x29c   :  { %329 = vst.msk [vmem:[%s698_s8] sm:$0xff] %vm328_vm1, %v326_v10 }

</bundles_post_ra>
